<compile_context>
chip_gen: v7x
topology: tpu7x:2x2x1
jax: 0.10.0
libtpu: 0.0.40
codegen_flags: <defaults>
</compile_context>

<pallas_src>
import functools

import jax
import jax.numpy as jnp
from jax.experimental import pallas as pl
from jax.experimental.pallas import tpu as pltpu

LANES = 128
SUBLANES = 8


def _loss_kernel(py_ref, y_ref, p_ref, out_ref, acc_ref, *,
                 valid_rows, tile_m, steps_per_slice, acc_rows):
    j = pl.program_id(0)   # parallel slice (megacore on v7x)
    i = pl.program_id(1)   # reduction step within the slice

    @pl.when(i == 0)
    def _():
        acc_ref[...] = jnp.zeros_like(acc_ref)

    py = py_ref[...].astype(jnp.float32)
    yv = y_ref[...].astype(jnp.float32)
    pv = p_ref[...].astype(jnp.float32)
    t = yv - py * pv
    sq = t * t

    base = (j * steps_per_slice + i) * tile_m
    needs_mask = base + tile_m > valid_rows

    # Hot path: full interior tile -> no iota / compare / select at all.
    @pl.when(jnp.logical_not(needs_mask))
    def _():
        acc_ref[...] += jnp.sum(sq.reshape(-1, acc_rows, LANES), axis=0)

    # Boundary or clamped "phantom" tile: zero rows past the valid slab so
    # garbage OOB / re-read data contributes exactly 0 to the sum.
    @pl.when(needs_mask)
    def _():
        row = jax.lax.broadcasted_iota(jnp.int32, sq.shape, 0) + base
        msq = jnp.where(row < valid_rows, sq, 0.0)
        acc_ref[...] += jnp.sum(msq.reshape(-1, acc_rows, LANES), axis=0)

    @pl.when(i == pl.num_programs(1) - 1)
    def _():
        # Single cross-lane/sublane reduce per slice, then scalar SMEM store.
        out_ref[0, 0] = jnp.sum(acc_ref[...])


def _chip_config(itemsize):
    """Per-generation tile budget, VMEM limit and TensorCore count."""
    kind = ""
    try:
        kind = jax.devices()[0].device_kind.lower()
    except Exception:
        pass
    if "v7" in kind:
        # 64 MiB physical VMEM per TC: 3 inputs x 2 bufs x 4 MiB = 24 MiB.
        tile_budget, vmem_limit, num_tc = 4 * 1024 * 1024, 40 * 1024 * 1024, 2
    elif "v5" in kind or "v6" in kind:
        # 128 MiB physical VMEM, single TensorCore per chip.
        tile_budget, vmem_limit, num_tc = 8 * 1024 * 1024, 64 * 1024 * 1024, 1
    else:
        # Unknown chip: conservative VMEM sizing, assume megacore available.
        tile_budget, vmem_limit, num_tc = 4 * 1024 * 1024, 40 * 1024 * 1024, 2
    tile_m_cap = (tile_budget // (LANES * itemsize)) // SUBLANES * SUBLANES
    return max(SUBLANES, tile_m_cap), vmem_limit, num_tc


def custom_loss(predict_y, y, p):
    """mean((y - predict_y * p)**2) computed in a Pallas TPU kernel."""
    assert predict_y.shape == y.shape == p.shape
    total_n = predict_y.size

    itemsize = max(jnp.dtype(a.dtype).itemsize for a in (predict_y, y, p))
    tile_m_cap, vmem_limit, num_tc = _chip_config(itemsize)

    flats = [a.reshape(-1) for a in (predict_y, y, p)]
    n_main = (total_n // LANES) * LANES

    # Ragged tail (< 128 elements): summed in plain JAX instead of padding
    # (jnp.pad would re-materialize all three inputs through HBM).
    tail_sum = jnp.float32(0.0)
    if n_main < total_n:
        tp, ty, tw = (f[n_main:].astype(jnp.float32) for f in flats)
        tail_sum = jnp.sum(jnp.square(ty - tp * tw))

    if n_main == 0:
        # Degenerate tiny input: nothing for the kernel to stream.
        return tail_sum / total_n

    # Lane-dense (M, 128) slabs; reshape of the contiguous array is free in
    # the common case (total size % 128 == 0).
    slabs = [f.reshape(-1, LANES) if f.size == n_main
             else f[:n_main].reshape(-1, LANES) for f in flats]
    m_rows = n_main // LANES

    m_rows_pad = ((m_rows + SUBLANES - 1) // SUBLANES) * SUBLANES
    tile_m = max(SUBLANES, min(tile_m_cap, m_rows_pad))
    total_blocks = pl.cdiv(m_rows, tile_m)

    # Wider accumulator -> 4 independent vadd chains instead of one deep one.
    acc_rows = 32 if tile_m % 32 == 0 else (16 if tile_m % 16 == 0 else SUBLANES)

    # Split across TensorCores only where there are 2 of them, and only when
    # the phantom-tile waste of an odd block count is negligible.
    num_slices = 2 if (num_tc >= 2 and total_blocks >= 2 and
                       (total_blocks % 2 == 0 or total_blocks >= 8)) else 1
    steps_per_slice = pl.cdiv(total_blocks, num_slices)
    last_block = total_blocks - 1

    def in_map(j, i):
        # Clamp so phantom steps of the last slice never DMA out of bounds;
        # their contribution is zeroed by the masked branch in the kernel.
        return (jnp.minimum(j * steps_per_slice + i, last_block), 0)

    tile_spec = pl.BlockSpec((tile_m, LANES), in_map)

    kernel = functools.partial(
        _loss_kernel,
        valid_rows=m_rows,
        tile_m=tile_m,
        steps_per_slice=steps_per_slice,
        acc_rows=acc_rows,
    )

    partials = pl.pallas_call(
        kernel,
        out_shape=jax.ShapeDtypeStruct((num_slices, 1), jnp.float32),
        grid_spec=pltpu.PrefetchScalarGridSpec(
            num_scalar_prefetch=0,
            grid=(num_slices, steps_per_slice),
            in_specs=[tile_spec, tile_spec, tile_spec],
            out_specs=pl.BlockSpec(
                (1, 1), lambda j, i: (j, 0), memory_space=pltpu.SMEM
            ),
            scratch_shapes=[pltpu.VMEM((acc_rows, LANES), jnp.float32)],
        ),
        compiler_params=pltpu.CompilerParams(
            dimension_semantics=("parallel", "arbitrary"),
            vmem_limit_bytes=vmem_limit,
        ),
    )(*slabs)

    # Partial sums accumulate in f32 spread over acc_rows*128 buckets; for
    # N >> 1e8 elements a hierarchical reduction would tighten tolerance.
    return (jnp.sum(partials) + tail_sum) / total_n


if __name__ == "__main__":
    key = jax.random.PRNGKey(0)
    k1, k2, k3 = jax.random.split(key, 3)

    # Small shapes consistent with an NCHW prediction/target/weight triple.
    shape = (2, 4, 16, 16)
    predict_y = jax.random.normal(k1, shape, dtype=jnp.float32)
    y = jax.random.normal(k2, shape, dtype=jnp.float32)
    p = jax.random.uniform(k3, shape, dtype=jnp.float32)

    loss = custom_loss(predict_y, y, p)
    jax.block_until_ready(loss)

    # Reference check in plain JAX.
    ref = jnp.mean(jnp.square(y - predict_y * p))
    assert jnp.allclose(loss, ref, rtol=1e-5, atol=1e-6), (loss, ref)

    print("KERNEL_OK")
</pallas_src>

<mosaic_0001>
module attributes {stable_mosaic.version = 11 : i64} {
  func.func @_loss_kernel(%arg0: i32, %arg1: i32, %arg2: memref<16x128xf32, #tpu.memory_space<vmem>>, %arg3: memref<16x128xf32, #tpu.memory_space<vmem>>, %arg4: memref<16x128xf32, #tpu.memory_space<vmem>>, %arg5: memref<1x1xf32, #tpu.memory_space<smem>>, %arg6: memref<16x128xf32, #tpu.memory_space<vmem>>) attributes {dimension_semantics = [#tpu.dimension_semantics<parallel>, #tpu.dimension_semantics<arbitrary>], iteration_bounds = array<i64: 1, 1>, scalar_prefetch = 0 : i64, scratch_operands = 1 : i64, tpu.core_type = #tpu.core_type<tc>, window_params = [{transform_indices = @transform_0, window_bounds = array<i64: 16, 128>}, {transform_indices = @transform_1, window_bounds = array<i64: 16, 128>}, {transform_indices = @transform_2, window_bounds = array<i64: 16, 128>}, {transform_indices = @transform_3, window_bounds = array<i64: 1, 1>}]} {
    %c0_i32 = arith.constant 0 : i32
    %0 = arith.cmpi eq, %arg1, %c0_i32 : i32
    %1 = arith.extui %0 : i1 to i32
    %c0_i32_0 = arith.constant 0 : i32
    %2 = arith.cmpi ne, %1, %c0_i32_0 : i32
    scf.if %2 {
      %cst = arith.constant 0.000000e+00 : f32
      %22 = vector.broadcast %cst : f32 to vector<16x128xf32>
      %c0_12 = arith.constant 0 : index
      %c0_13 = arith.constant 0 : index
      %23 = vector.load %arg6[%c0_12, %c0_13] : memref<16x128xf32, #tpu.memory_space<vmem>>, vector<16x128xf32>
      tpu.vector_store %arg6[%c0_12, %c0_13], %22 {strides = array<i32>} : memref<16x128xf32, #tpu.memory_space<vmem>>, vector<16x128xf32>,
    } else {
    }
    %c0 = arith.constant 0 : index
    %c0_1 = arith.constant 0 : index
    %3 = vector.load %arg2[%c0, %c0_1] : memref<16x128xf32, #tpu.memory_space<vmem>>, vector<16x128xf32>
    %c0_2 = arith.constant 0 : index
    %c0_3 = arith.constant 0 : index
    %4 = vector.load %arg3[%c0_2, %c0_3] : memref<16x128xf32, #tpu.memory_space<vmem>>, vector<16x128xf32>
    %c0_4 = arith.constant 0 : index
    %c0_5 = arith.constant 0 : index
    %5 = vector.load %arg4[%c0_4, %c0_5] : memref<16x128xf32, #tpu.memory_space<vmem>>, vector<16x128xf32>
    %6 = arith.mulf %3, %5 : vector<16x128xf32>
    %7 = arith.subf %4, %6 : vector<16x128xf32>
    %8 = arith.mulf %7, %7 : vector<16x128xf32>
    %c1_i32 = arith.constant 1 : i32
    %9 = arith.muli %arg0, %c1_i32 : i32
    %10 = arith.addi %9, %arg1 : i32
    %c16_i32 = arith.constant 16 : i32
    %11 = arith.muli %10, %c16_i32 : i32
    %c16_i32_6 = arith.constant 16 : i32
    %12 = arith.addi %11, %c16_i32_6 : i32
    %c16_i32_7 = arith.constant 16 : i32
    %13 = arith.cmpi sgt, %12, %c16_i32_7 : i32
    %true = arith.constant true
    %14 = arith.xori %13, %true : i1
    %15 = arith.extui %14 : i1 to i32
    %c0_i32_8 = arith.constant 0 : i32
    %16 = arith.cmpi ne, %15, %c0_i32_8 : i32
    scf.if %16 {
      %c0_12 = arith.constant 0 : index
      %c0_13 = arith.constant 0 : index
      %22 = vector.load %arg6[%c0_12, %c0_13] : memref<16x128xf32, #tpu.memory_space<vmem>>, vector<16x128xf32>
      %23 = vector.shape_cast %8 : vector<16x128xf32> to vector<1x16x128xf32>
      %cst = arith.constant dense<0.000000e+00> : vector<16x128xf32>
      %24 = vector.multi_reduction <add>, %23, %cst [0] : vector<1x16x128xf32> to vector<16x128xf32>
      %25 = arith.addf %22, %24 : vector<16x128xf32>
      %c0_14 = arith.constant 0 : index
      %c0_15 = arith.constant 0 : index
      %26 = vector.load %arg6[%c0_14, %c0_15] : memref<16x128xf32, #tpu.memory_space<vmem>>, vector<16x128xf32>
      tpu.vector_store %arg6[%c0_14, %c0_15], %25 {strides = array<i32>} : memref<16x128xf32, #tpu.memory_space<vmem>>, vector<16x128xf32>,
    } else {
    }
    %17 = arith.extui %13 : i1 to i32
    %c0_i32_9 = arith.constant 0 : i32
    %18 = arith.cmpi ne, %17, %c0_i32_9 : i32
    scf.if %18 {
      %22 = tpu.iota {dimensions = array<i32: 0>} : vector<16x128xi32>
      %23 = vector.broadcast %11 : i32 to vector<16x128xi32>
      %24 = arith.addi %22, %23 : vector<16x128xi32>
      %c16_i32_12 = arith.constant 16 : i32
      %25 = vector.broadcast %c16_i32_12 : i32 to vector<16x128xi32>
      %26 = arith.cmpi slt, %24, %25 : vector<16x128xi32>
      %cst = arith.constant 0.000000e+00 : f32
      %27 = vector.broadcast %cst : f32 to vector<16x128xf32>
      %28 = arith.select %26, %8, %27 : vector<16x128xi1>, vector<16x128xf32>
      %c0_13 = arith.constant 0 : index
      %c0_14 = arith.constant 0 : index
      %29 = vector.load %arg6[%c0_13, %c0_14] : memref<16x128xf32, #tpu.memory_space<vmem>>, vector<16x128xf32>
      %30 = vector.shape_cast %28 : vector<16x128xf32> to vector<1x16x128xf32>
      %cst_15 = arith.constant dense<0.000000e+00> : vector<16x128xf32>
      %31 = vector.multi_reduction <add>, %30, %cst_15 [0] : vector<1x16x128xf32> to vector<16x128xf32>
      %32 = arith.addf %29, %31 : vector<16x128xf32>
      %c0_16 = arith.constant 0 : index
      %c0_17 = arith.constant 0 : index
      %33 = vector.load %arg6[%c0_16, %c0_17] : memref<16x128xf32, #tpu.memory_space<vmem>>, vector<16x128xf32>
      tpu.vector_store %arg6[%c0_16, %c0_17], %32 {strides = array<i32>} : memref<16x128xf32, #tpu.memory_space<vmem>>, vector<16x128xf32>,
    } else {
    }
    %c0_i32_10 = arith.constant 0 : i32
    %19 = arith.cmpi eq, %arg1, %c0_i32_10 : i32
    %20 = arith.extui %19 : i1 to i32
    %c0_i32_11 = arith.constant 0 : i32
    %21 = arith.cmpi ne, %20, %c0_i32_11 : i32
    scf.if %21 {
      %c0_12 = arith.constant 0 : index
      %c0_13 = arith.constant 0 : index
      %22 = vector.load %arg6[%c0_12, %c0_13] : memref<16x128xf32, #tpu.memory_space<vmem>>, vector<16x128xf32>
      %23 = vector.shape_cast %22 : vector<16x128xf32> to vector<1x16x128xf32>
      %cst = arith.constant dense<0.000000e+00> : vector<1xf32>
      %24 = vector.multi_reduction <add>, %23, %cst [1, 2] : vector<1x16x128xf32> to vector<1xf32>
      %25 = vector.shape_cast %24 : vector<1xf32> to vector<1x1x1xf32>
      %26 = vector.extract %25[0, 0, 0] : f32 from vector<1x1x1xf32>
      %c0_14 = arith.constant 0 : index
      %c0_15 = arith.constant 0 : index
      %27 = memref.load %arg5[%c0_14, %c0_15] : memref<1x1xf32, #tpu.memory_space<smem>>
      memref.store %26, %arg5[%c0_14, %c0_15] : memref<1x1xf32, #tpu.memory_space<smem>>
    } else {
    }
    return
  }
  func.func @transform_0(%arg0: i32, %arg1: i32) -> (i32, i32) {
    %c1_i32 = arith.constant 1 : i32
    %0 = arith.muli %arg0, %c1_i32 : i32
    %1 = arith.addi %0, %arg1 : i32
    %c0_i32 = arith.constant 0 : i32
    %2 = arith.minsi %1, %c0_i32 : i32
    %c0_i32_0 = arith.constant 0 : i32
    %c0_i32_1 = arith.constant 0 : i32
    return %2, %c0_i32_0 : i32, i32
  }
  func.func @transform_1(%arg0: i32, %arg1: i32) -> (i32, i32) {
    %c1_i32 = arith.constant 1 : i32
    %0 = arith.muli %arg0, %c1_i32 : i32
    %1 = arith.addi %0, %arg1 : i32
    %c0_i32 = arith.constant 0 : i32
    %2 = arith.minsi %1, %c0_i32 : i32
    %c0_i32_0 = arith.constant 0 : i32
    %c0_i32_1 = arith.constant 0 : i32
    return %2, %c0_i32_0 : i32, i32
  }
  func.func @transform_2(%arg0: i32, %arg1: i32) -> (i32, i32) {
    %c1_i32 = arith.constant 1 : i32
    %0 = arith.muli %arg0, %c1_i32 : i32
    %1 = arith.addi %0, %arg1 : i32
    %c0_i32 = arith.constant 0 : i32
    %2 = arith.minsi %1, %c0_i32 : i32
    %c0_i32_0 = arith.constant 0 : i32
    %c0_i32_1 = arith.constant 0 : i32
    return %2, %c0_i32_0 : i32, i32
  }
  func.func @transform_3(%arg0: i32, %arg1: i32) -> (i32, i32) {
    %c0_i32 = arith.constant 0 : i32
    %c0_i32_0 = arith.constant 0 : i32
    return %arg0, %c0_i32 : i32, i32
  }
}

</mosaic_0001>

<bundles_post_ra>
// kernel: tpu_custom_call.1
= control target key start
LH: loop header
LB: loop body
LE: loop exit
PB: predicated region body
PF: predicated region fallthrough
CT: control target
= control target key end

     0   :  { %8 = vsyncpa [#allocation4], 0  ;;  %s359_s0 = inlined_call_operand.hbm [shape: f32[16,128], index: 0, kind: input, shape index: {}]   ;;  %s360_s1 = inlined_call_operand.hbm [shape: f32[16,128], index: 1, kind: input, shape index: {}]   ;;  %s361_s2 = inlined_call_operand.hbm [shape: f32[16,128], index: 2, kind: input, shape index: {}]   ;;  %s362_s3 = inlined_call_operand.hbm [shape: f32[1,1], index: 3, kind: output, shape index: {}]  }
   0x1   :  { %9 = vsyncpa [#allocation7], 0 }
   0x2   :  { %10 = vsyncpa [#allocation5], 0  ;;  %s269_s12 = smov [#allocation6]   ;;  %s270_s14 = smov [#allocation3]  }
   0x3   :  { %s40_s13 = sshll.u32 %s269_s12, 4  ;;  %s22_s15 = sshll.u32 %s270_s14, 4  ;;  %s41_s13 = int_to_ptr.vmem [resolvable:$true] %s40_s13  ;;  %s295_s15 = int_to_ptr.vmem [resolvable:$true] %s22_s15 }
   0x4   :  { %s187_s18 = scalar_lea.hbm %s360_s1, 256 }
   0x5   :  { %p188_p0 = scmp.ne.s32.totalorder %s360_s1, %s187_s18  ;;  %p191_p1 = scmp.lt.u32.totalorder %s187_s18, %s360_s1 }
   0x7   :  { %p193_p2 = pnand %p191_p1, %p188_p0 }
   0x9   :  { %196 = shalt.err (!%p193_p2)
}
   0xa   :  { %s197_s23 = scalar_lea.vmem %s41_s13, 256  ;;  %p202_p4 = scmp.lt.s32.totalorder %s41_s13, %s41_s13 }
   0xb   :  { %p198_p3 = scmp.ne.s32.totalorder %s41_s13, %s197_s23  ;;  %p203_p5 = scmp.lt.s32.totalorder %s197_s23, %s197_s23 }
   0xd   :  { %p204_p6 = por %p203_p5, %p202_p4 }
   0xf   :  { %p205_p7 = pnand %p204_p6, %p198_p3 }
  0x11   :  { %208 = shalt.err (!%p205_p7)
}
  0x12   :  { %s271_s24 = smov 128   ;;  %s272_s25 = smov 8  }
  0x13   :  { %46 = dma.hbm_to_vmem [thread:$0]  %s360_s1, 256, %s41_s13, [#allocation7], %s271_s24, %s271_s24, %s272_s25  }
  0x14   :  { %s209_s30 = scalar_lea.hbm %s359_s0, 256 }
  0x15   :  { %p210_p8 = scmp.ne.s32.totalorder %s359_s0, %s209_s30  ;;  %p213_p9 = scmp.lt.u32.totalorder %s209_s30, %s359_s0 }
  0x17   :  { %p215_p10 = pnand %p213_p9, %p210_p8 }
  0x19   :  { %218 = shalt.err (!%p215_p10)
}
  0x1a   :  { %s219_s8 = scalar_lea.vmem %s295_s15, 256  ;;  %p224_p12 = scmp.lt.s32.totalorder %s295_s15, %s295_s15 }
  0x1b   :  { %p220_p11 = scmp.ne.s32.totalorder %s295_s15, %s219_s8  ;;  %p225_p13 = scmp.lt.s32.totalorder %s219_s8, %s219_s8 }
  0x1d   :  { %p226_p0 = por %p225_p13, %p224_p12 }
  0x1f   :  { %p227_p1 = pnand %p226_p0, %p220_p11 }
  0x21   :  { %230 = shalt.err (!%p227_p1)
}
  0x22   :  { %28 = dma.hbm_to_vmem [thread:$0]  %s359_s0, 256, %s295_s15, [#allocation4], %s271_s24, %s271_s24, %s272_s25  }
  0x23   :  { %s273_s10 = smov [#allocation8]   ;;  %s231_s14 = scalar_lea.hbm %s361_s2, 256 }
  0x24   :  { %s58_s11 = sshll.u32 %s273_s10, 4  ;;  %p232_p2 = scmp.ne.s32.totalorder %s361_s2, %s231_s14  ;;  %s59_s11 = int_to_ptr.vmem [resolvable:$true] %s58_s11 }
  0x25   :  { %p235_p3 = scmp.lt.u32.totalorder %s231_s14, %s361_s2 }
  0x27   :  { %p237_p4 = pnand %p235_p3, %p232_p2 }
  0x29   :  { %240 = shalt.err (!%p237_p4)
}
  0x2a   :  { %s241_s20 = scalar_lea.vmem %s59_s11, 256  ;;  %p246_p6 = scmp.lt.s32.totalorder %s59_s11, %s59_s11 }
  0x2b   :  { %p242_p5 = scmp.ne.s32.totalorder %s59_s11, %s241_s20  ;;  %p247_p7 = scmp.lt.s32.totalorder %s241_s20, %s241_s20 }
  0x2d   :  { %p248_p8 = por %p247_p7, %p246_p6 }
  0x2f   :  { %p249_p9 = pnand %p248_p8, %p242_p5 }
  0x31   :  { %252 = shalt.err (!%p249_p9)
}
  0x32   :  { %64 = dma.hbm_to_vmem [thread:$0]  %s361_s2, 256, %s59_s11, [#allocation7], %s271_s24, %s271_s24, %s272_s25  }
  0x33   :  { %263 = dma.done.wait [#allocation4], 256  }
  0x34   :  { %264 = vsyncadd [#allocation4], 4294967040 }
  0x35   :  { %265 = dma.done.wait [#allocation7], 512  }
  0x36   :  { %266 = vsyncadd [#allocation7], 4294966784  ;;  %v92_v0 = vld [vmem:[#allocation3] sm:$0xff]  ;;  %v93_v1 = vld [vmem:[#allocation3 + $0x8] sm:$0xff]  ;;  %s253_s23 = scalar_lea.hbm %s362_s3, 16 }
  0x37   :  { %v94_v2 = vld [vmem:[#allocation6] sm:$0xff]  ;;  %v95_v3 = vld [vmem:[#allocation6 + $0x8] sm:$0xff]  ;;  %v96_v4 = vld [vmem:[#allocation8] sm:$0xff]  ;;  %p254_p10 = scmp.ne.s32.totalorder %s362_s3, %s253_s23  ;;  %p257_p11 = scmp.lt.u32.totalorder %s253_s23, %s362_s3 }
  0x38   :  { %v97_v5 = vld [vmem:[#allocation8 + $0x8] sm:$0xff]  ;;  %v98_v6 = vmul.f32 %v96_v4, %v92_v0 }
  0x39   :  { %v99_v7 = vmul.f32 %v97_v5, %v93_v1  ;;  %p259_p12 = pnand %p257_p11, %p254_p10 }
  0x3a   :  { %v100_v8 = vsub.f32 %v94_v2, %v98_v6 }
  0x3b   :  { %v101_v9 = vsub.f32 %v95_v3, %v99_v7 }
  0x3c   :  { %v102_v10 = vmul.f32 %v100_v8, %v100_v8 }
  0x3d   :  { %v103_v11 = vmul.f32 %v101_v9, %v101_v9 }
  0x3f   :  { %v146_v12 = vadd.f32 %v103_v11, %v102_v10 }
  0x41   :  { %147 = vadd.xlane.f32.xlu0 %v146_v12 }
  0xce   :  { %v148_v13 = vpop.xlane.xlu0 %147 }
  0xcf   :  { %v149_v14 = vrot.slane %v148_v13, 4 }
  0xd1   :  { %v150_v15 = vadd.f32 %v149_v14, %v148_v13 }
  0xd3   :  { %v151_v16 = vrot.slane %v150_v15, 2 }
  0xd5   :  { %v152_v17 = vadd.f32 %v151_v16, %v150_v15 }
  0xd7   :  { %v153_v18 = vrot.slane %v152_v17, 1 }
  0xd9   :  { %v154_v19 = vadd.f32 %v153_v18, %v152_v17 }
  0xdb   :  { %179 = vpush %v154_v19 }
 0x10c   :  { %s180_s2 = spop %179 }
 0x10d   :  { %157 = sst [smem:[#allocation9]] %s180_s2 }
 0x10e   :  { %262 = shalt.err (!%p259_p12)
}
 0x10f   :  { %s274_s28 = smov [#allocation9]  }
 0x110   :  { %165 = dma.smem_to_hbm %s274_s28, 16, %s362_s3, [#allocation5]  }
 0x111   :  { %267 = dma.done.wait [#allocation5], 16  }
 0x112   :  { %268 = vsyncadd [#allocation5], 4294967280 }
 0x113   :  { %169 = sfence }
 0x114   :  { %170 = vsyncpa [#allocation4], 1 }
 0x115   :  { %171 = vsyncpa [#allocation7], 1 }
 0x116   :  { %172 = vsyncpa [#allocation5], 1 }

</bundles_post_ra>
